<compile_context>
chip_gen: v5e
topology: v5e:2x2
jax: 0.10.0
libtpu: 0.0.40
codegen_flags: <defaults>
</compile_context>

<pallas_src>
import math

import jax
import jax.numpy as jnp
from jax.experimental import pallas as pl
from jax.experimental.pallas import tpu as pltpu

_EPS = 1e-8


def _round_up(x, m):
    return ((x + m - 1) // m) * m


_BUDGET_CACHE = None


def _vmem_budget():
    """(per-input-block byte budget, vmem_limit_bytes), generation aware."""
    global _BUDGET_CACHE
    if _BUDGET_CACHE is None:
        cap = None
        try:
            cap = getattr(pltpu.get_tpu_info(), "vmem_capacity_bytes", None)
        except Exception:
            cap = None
        if cap is not None and cap >= 100 * 1024 * 1024:
            # v5e / v6e: 128 MiB physical VMEM -> larger streaming blocks.
            _BUDGET_CACHE = (4 * 1024 * 1024, 64 * 1024 * 1024)
        else:
            # v7x (64 MiB / TC) or unknown: stay inside the 32 MiB scoped VMEM.
            _BUDGET_CACHE = (2 * 1024 * 1024, 32 * 1024 * 1024)
    return _BUDGET_CACHE


def _row_tile(rows, bytes_per_row, budget):
    """Row-block size: multiple of 8 (or the full row count), sized from the
    VMEM budget, and capped so the 'parallel' grid axis gets >= 2 steps
    (v7x has 2 TensorCores; the extra step is noise on 1-TC parts)."""
    if rows <= 8:
        return rows
    tm = budget // max(bytes_per_row, 1)
    tm = max(8, (tm // 8) * 8)
    if rows >= 16:
        tm = min(tm, max(8, _round_up((rows + 1) // 2, 8)))
    return min(tm, _round_up(rows, 8))


def _group_factor(C, M):
    """Rows-per-group k so a grouped row of k*C elements is (nearly) lane
    dense.  Returns None when grouping is not worthwhile / not applicable."""
    if C >= 128:
        return None
    k = 128 // math.gcd(C, 128)          # k*C is a multiple of 128
    # Cap k so the in-kernel (k*C, k) bf16 selector stays <= ~1 MiB.  Lane
    # density stays >= ~97%: the only waste is the last partial vreg per row.
    while k > 8 and k * k * C * 2 > (1 << 20):
        k //= 2
    if M % k != 0:
        k2 = math.gcd(k, M)
        if k2 * C >= 128:                # still lane-dense and avoids any pad
            k = k2
    if M < 8 * k:                        # too few rows for one grouped tile
        return None
    return k


# ---------------------------------------------------------------------------
# Grouped (small-C) path: (M, C) --free reshape--> (R, W) with W = k*C.
# Per-group reduction = 0/1-selector matmul on the (idle) MXU.
# ---------------------------------------------------------------------------
def _make_grouped_kernel(C, k):
    W = k * C

    def kernel(p_ref, o_ref):
        # 0/1 selector summing each C-wide lane group into one output column;
        # exact in bf16, generated on the VPU (no HBM / pipeline traffic).
        lane = jax.lax.broadcasted_iota(jnp.int32, (W, k), 0)
        col = jax.lax.broadcasted_iota(jnp.int32, (W, k), 1) * C
        sel = ((lane >= col) & (lane < col + C)).astype(jnp.bfloat16)

        p = p_ref[...]
        if p.dtype == jnp.bfloat16:
            # bf16 log: 2x EUP throughput on v6e/v7x; f32 MXU accumulation.
            t = p * jnp.log(p + jnp.asarray(_EPS, p.dtype))
            acc = jnp.dot(t, sel, preferred_element_type=jnp.float32)
        else:
            pf = p.astype(jnp.float32)
            t = pf * jnp.log(pf + _EPS)
            # 3-way bf16 split -> grouped sum is f32-accurate independent of
            # the MXU's default f32 matmul precision (extra passes are free:
            # the MXU is otherwise idle in this kernel).
            t0 = t.astype(jnp.bfloat16)
            r = t - t0.astype(jnp.float32)
            t1 = r.astype(jnp.bfloat16)
            t2 = (r - t1.astype(jnp.float32)).astype(jnp.bfloat16)
            acc = (jnp.dot(t0, sel, preferred_element_type=jnp.float32)
                   + jnp.dot(t1, sel, preferred_element_type=jnp.float32)
                   + jnp.dot(t2, sel, preferred_element_type=jnp.float32))
        o_ref[...] = (-acc).astype(o_ref.dtype)

    return kernel


def _entropy_grouped(p2d, k):
    M, C = p2d.shape
    elem = p2d.dtype.itemsize
    budget, vmem_limit = _vmem_budget()

    Mp = M
    if M % k != 0:
        # TODO(synk): rare fallback (M not divisible by any lane-dense group
        # size); costs one extra HBM pass over the input.
        Mp = _round_up(M, k)
        p2d = jnp.pad(p2d, ((0, Mp - M), (0, 0)))   # zero rows -> entropy 0

    W = k * C
    R = Mp // k
    pg = p2d.reshape(R, W)               # pure-metadata (contiguous) reshape

    tm = _row_tile(R, W * elem, budget)
    out = pl.pallas_call(
        _make_grouped_kernel(C, k),
        out_shape=jax.ShapeDtypeStruct((R, k), p2d.dtype),
        grid_spec=pltpu.PrefetchScalarGridSpec(
            num_scalar_prefetch=0,
            grid=(-(-R // tm),),
            in_specs=[pl.BlockSpec((tm, W), lambda i: (i, 0))],
            out_specs=pl.BlockSpec((tm, k), lambda i: (i, 0)),
        ),
        compiler_params=pltpu.CompilerParams(
            dimension_semantics=("parallel",),
            vmem_limit_bytes=vmem_limit,
        ),
    )(pg)
    return out.reshape(R * k)[:M]


# ---------------------------------------------------------------------------
# Row-sum (large-C / fallback) path: natural (M, C) layout, (tm, tc) tiles,
# class axis on an "arbitrary" grid axis with an f32 per-row accumulator.
# Ragged class tiles are masked in-kernel (no wrapper-side padding at all).
# ---------------------------------------------------------------------------
def _make_rowsum_kernel(C, tc, ragged_c):
    def kernel(p_ref, o_ref, acc_ref):
        j = pl.program_id(1)

        @pl.when(j == 0)
        def _():
            acc_ref[...] = jnp.zeros_like(acc_ref)

        p = p_ref[...]
        if ragged_c:
            # Mask out-of-range classes to 0 BEFORE the log: 0*log(1e-8) == 0,
            # and garbage (possibly NaN) can never reach the accumulator.
            col = jax.lax.broadcasted_iota(jnp.int32, p.shape, 1) + j * tc
            p = jnp.where(col < C, p, jnp.zeros((), p.dtype))
        if p.dtype == jnp.bfloat16:
            t = (p * jnp.log(p + jnp.asarray(_EPS, p.dtype))).astype(jnp.float32)
        else:
            pf = p.astype(jnp.float32)
            t = pf * jnp.log(pf + _EPS)
        acc_ref[...] += jnp.sum(t, axis=-1, keepdims=True)

        @pl.when(j == pl.num_programs(1) - 1)
        def _():
            o_ref[...] = (-acc_ref[...]).astype(o_ref.dtype)

    return kernel


def _entropy_rowsum(p2d):
    M, C = p2d.shape
    elem = p2d.dtype.itemsize
    budget, vmem_limit = _vmem_budget()

    tc_cap = max(128, ((budget // (8 * elem)) // 128) * 128)
    tc = min(_round_up(C, 128), tc_cap)
    tm = _row_tile(M, tc * elem, budget)
    ragged_c = (C % tc) != 0

    out = pl.pallas_call(
        _make_rowsum_kernel(C, tc, ragged_c),
        out_shape=jax.ShapeDtypeStruct((M, 1), p2d.dtype),
        grid_spec=pltpu.PrefetchScalarGridSpec(
            num_scalar_prefetch=0,
            grid=(-(-M // tm), -(-C // tc)),
            in_specs=[pl.BlockSpec((tm, tc), lambda i, j: (i, j))],
            out_specs=pl.BlockSpec((tm, 1), lambda i, j: (i, 0)),
            scratch_shapes=[pltpu.VMEM((tm, 1), jnp.float32)],
        ),
        compiler_params=pltpu.CompilerParams(
            dimension_semantics=("parallel", "arbitrary"),
            vmem_limit_bytes=vmem_limit,
        ),
    )(p2d)
    return out[:, 0]


def entropy_loss(probs):
    """Equivalent of EntropyLoss().forward(probs): reduces the last axis."""
    orig_shape = probs.shape
    C = orig_shape[-1]
    M = math.prod(orig_shape[:-1])
    p2d = probs.reshape(M, C)
    k = _group_factor(C, M)
    if k is None:
        flat = _entropy_rowsum(p2d)
    else:
        flat = _entropy_grouped(p2d, k)
    return flat.reshape(orig_shape[:-1])


if __name__ == "__main__":
    def ref_entropy(p):
        p32 = p.astype(jnp.float32)
        return jnp.sum(-p32 * jnp.log(p32 + 1e-8), axis=-1)

    keys = jax.random.split(jax.random.PRNGKey(0), 7)

    cases = [
        (2, 4, 16, 16),   # grouped path: C=16, k=8, W=128
        (2, 8, 256),      # row-sum path: exact class tile, no masking
        (3, 7, 300),      # row-sum path: ragged class + ragged row tiles
        (8, 64, 33),      # grouped path: capped k=64, W=2112 (not 128-mult)
        (7, 11, 13, 16),  # grouped path: M % k != 0 (pad fallback)
        (5, 13),          # tiny M -> row-sum fallback with C < 128
    ]
    for i, shape in enumerate(cases):
        logits = jax.random.normal(keys[i], shape, dtype=jnp.float32)
        probs = jax.nn.softmax(logits, axis=-1)
        out = jax.block_until_ready(entropy_loss(probs))
        ref = ref_entropy(probs)
        assert out.shape == shape[:-1]
        err = float(jnp.max(jnp.abs(out.astype(jnp.float32) - ref)))
        assert jnp.allclose(out.astype(jnp.float32), ref,
                            atol=2e-5, rtol=2e-5), (shape, err)

    # bf16 inputs: log computed in bf16 (2x EUP rate on v6e/v7x), f32 accum.
    logits = jax.random.normal(keys[6], (2, 4, 16, 16), dtype=jnp.float32)
    probs_bf16 = jax.nn.softmax(logits, axis=-1).astype(jnp.bfloat16)
    out = jax.block_until_ready(entropy_loss(probs_bf16))
    ref = ref_entropy(probs_bf16)
    assert out.shape == (2, 4, 16)
    assert jnp.allclose(out.astype(jnp.float32), ref, atol=3e-2, rtol=3e-2)

    print("KERNEL_OK")
</pallas_src>

<mosaic_0001>
module attributes {stable_mosaic.version = 11 : i64} {
  func.func @kernel(%arg0: i32, %arg1: memref<8x128xf32, #tpu.memory_space<vmem>>, %arg2: memref<8x8xf32, #tpu.memory_space<vmem>>) attributes {dimension_semantics = [#tpu.dimension_semantics<parallel>], iteration_bounds = array<i64: 2>, scalar_prefetch = 0 : i64, scratch_operands = 0 : i64, tpu.core_type = #tpu.core_type<tc>, window_params = [{transform_indices = @transform_0, window_bounds = array<i64: 8, 128>}, {transform_indices = @transform_1, window_bounds = array<i64: 8, 8>}]} {
    %0 = tpu.iota {dimensions = array<i32: 0>} : vector<128x8xi32>
    %1 = tpu.iota {dimensions = array<i32: 1>} : vector<128x8xi32>
    %c16_i32 = arith.constant 16 : i32
    %2 = vector.broadcast %c16_i32 : i32 to vector<128x8xi32>
    %3 = arith.muli %1, %2 : vector<128x8xi32>
    %4 = arith.cmpi sge, %0, %3 : vector<128x8xi32>
    %c16_i32_0 = arith.constant 16 : i32
    %5 = vector.broadcast %c16_i32_0 : i32 to vector<128x8xi32>
    %6 = arith.addi %3, %5 : vector<128x8xi32>
    %7 = arith.cmpi slt, %0, %6 : vector<128x8xi32>
    %8 = arith.andi %4, %7 : vector<128x8xi1>
    %9 = arith.extui %8 : vector<128x8xi1> to vector<128x8xi32>
    %10 = arith.sitofp %9 : vector<128x8xi32> to vector<128x8xf32>
    %11 = arith.truncf %10 : vector<128x8xf32> to vector<128x8xbf16>
    %c0 = arith.constant 0 : index
    %c0_1 = arith.constant 0 : index
    %12 = vector.load %arg1[%c0, %c0_1] : memref<8x128xf32, #tpu.memory_space<vmem>>, vector<8x128xf32>
    %cst = arith.constant 9.99999993E-9 : f32
    %13 = vector.broadcast %cst : f32 to vector<8x128xf32>
    %14 = arith.addf %12, %13 : vector<8x128xf32>
    %15 = math.log %14 : vector<8x128xf32>
    %16 = arith.mulf %12, %15 : vector<8x128xf32>
    %17 = arith.truncf %16 : vector<8x128xf32> to vector<8x128xbf16>
    %18 = arith.extf %17 : vector<8x128xbf16> to vector<8x128xf32>
    %19 = arith.subf %16, %18 : vector<8x128xf32>
    %20 = arith.truncf %19 : vector<8x128xf32> to vector<8x128xbf16>
    %21 = arith.extf %20 : vector<8x128xbf16> to vector<8x128xf32>
    %22 = arith.subf %19, %21 : vector<8x128xf32>
    %23 = arith.truncf %22 : vector<8x128xf32> to vector<8x128xbf16>
    %cst_2 = arith.constant dense<0.000000e+00> : vector<8x8xf32>
    %24 = tpu.matmul %17, %11, %cst_2 {dimension_numbers = #tpu.dot_dimension_numbers<[1], [0], [0], [1], [0, 0, 1, 1], [], []>} : vector<8x128xbf16>, vector<128x8xbf16>, vector<8x8xf32> -> vector<8x8xf32>
    %cst_3 = arith.constant dense<0.000000e+00> : vector<8x8xf32>
    %25 = tpu.matmul %20, %11, %cst_3 {dimension_numbers = #tpu.dot_dimension_numbers<[1], [0], [0], [1], [0, 0, 1, 1], [], []>} : vector<8x128xbf16>, vector<128x8xbf16>, vector<8x8xf32> -> vector<8x8xf32>
    %26 = arith.addf %24, %25 : vector<8x8xf32>
    %cst_4 = arith.constant dense<0.000000e+00> : vector<8x8xf32>
    %27 = tpu.matmul %23, %11, %cst_4 {dimension_numbers = #tpu.dot_dimension_numbers<[1], [0], [0], [1], [0, 0, 1, 1], [], []>} : vector<8x128xbf16>, vector<128x8xbf16>, vector<8x8xf32> -> vector<8x8xf32>
    %28 = arith.addf %26, %27 : vector<8x8xf32>
    %cst_5 = arith.constant 0.000000e+00 : f32
    %29 = vector.broadcast %cst_5 : f32 to vector<8x8xf32>
    %30 = arith.subf %29, %28 : vector<8x8xf32>
    %c0_6 = arith.constant 0 : index
    %c0_7 = arith.constant 0 : index
    %31 = vector.load %arg2[%c0_6, %c0_7] : memref<8x8xf32, #tpu.memory_space<vmem>>, vector<8x8xf32>
    tpu.vector_store %arg2[%c0_6, %c0_7], %30 {strides = array<i32>} : memref<8x8xf32, #tpu.memory_space<vmem>>, vector<8x8xf32>,
    return
  }
  func.func @transform_0(%arg0: i32) -> (i32, i32) {
    %c0_i32 = arith.constant 0 : i32
    %c0_i32_0 = arith.constant 0 : i32
    return %arg0, %c0_i32 : i32, i32
  }
  func.func @transform_1(%arg0: i32) -> (i32, i32) {
    %c0_i32 = arith.constant 0 : i32
    %c0_i32_0 = arith.constant 0 : i32
    return %arg0, %c0_i32 : i32, i32
  }
}

</mosaic_0001>

<bundles_post_ra>
// kernel: tpu_custom_call.1
= control target key start
LH: loop header
LB: loop body
LE: loop exit
PB: predicated region body
PF: predicated region fallthrough
CT: control target
= control target key end

     0   :  { %6 = vsyncpa [#allocation3], 0  ;;  %s765_s0 = inlined_call_operand.hbm [shape: f32[16,128], index: 0, kind: input, shape index: {}]   ;;  %s766_s1 = inlined_call_operand.vmem [shape: f32[16,8], index: 1, kind: output, shape index: {}]  }
   0x1   :  { %8 = vsyncpa [#allocation3 + $0x1], 0  ;;  %s556_s6 = smov 0   ;;  %s558_s7 = smov 0  }
   0x2   :  { %s560_s8 = smov 0   ;;  %s562_s9 = smov 0  }
   0x3 LB: > { %s575_s10 = sadd.s32 4294967295, %s543_s9   ;;  %s578_s11 = sadd.s32 1, %s543_s9   ;;  %s543_s9 = sphi %s562_s9, %s779_s9   ;;  %s539_s8 = sphi %s560_s8, %s778_s8   ;;  %s535_s7 = sphi %s558_s7, %s777_s7   ;;  %s531_s6 = sphi %s556_s6, %s776_s6  }
   0x4   : > { %s18_s12 = ssub.s32 %s543_s9, %s578_s11  ;;  %s21_s13 = sadd.s32 1, %s539_s8 }
   0x5   : > { %p19_p0 = scmp.eq.s32.totalorder %s18_s12, 0  ;;  %p28_p1 = scmp.ne.s32.totalorder %s539_s8, %s535_s7 }
   0x6   : > { %p29_p2 = scmp.eq.s32.totalorder %s543_s9, 0  ;;  %p34_p3 = scmp.ne.s32.totalorder %s535_s7, %s531_s6 }
   0x7   : > { %s588_s14 = scalar_select %p19_p0, %s539_s8, %s21_s13  }
   0x8   : > { %p590_p4 = por %p29_p2, %p28_p1  ;;  %p35_p5 = scmp.eq.s32.totalorder %s575_s10, 0 }
   0x9   : > { %p443_p6 = scmp.lt.s32.totalorder %s543_s9, 2  ;;  %s84_s17 = sand.u32 1, %s539_s8  }
   0xa   : > { %p596_p7 = por %p35_p5, %p34_p3  ;;  %s366_s18 = sshll.u32 %s84_s17, 3 }
   0xb   : > { %s367_s19 = sshll.u32 %s543_s9, 3  ;;  %s88_s23 = scalar_lea.vmem [#allocation2], %s366_s18 }
   0xc   : > { %s92_s22 = scalar_lea.hbm %s765_s0, %s367_s19  ;;  %s96_s24 = sshll.u32 %s88_s23, 4  ;;  %s97_s24 = int_to_ptr.vmem [resolvable:$true] %s96_s24 }
   0xd   : > { %s94_s25 = sshll.u32 %s92_s22, 4  ;;  %p607_p8 = pnand %p443_p6, %p590_p4  ;;  %s95_s25 = int_to_ptr.hbm [resolvable:$true] %s94_s25 }
   0xe   : > { %p368_p9 = scmp.ge.s32.totalorder %s543_s9, 1  ;;  %p101_p10 = scmp.lt.s32.totalorder %s543_s9, 3 }
   0xf   : > { %s85_s27 = scalar_lea.sflag [#allocation3], %s84_s17  ;;  %s479_s28 = sshra.s32 %s95_s25, 4  ;;  %s480_s28 = int_to_ptr.hbm [resolvable:$true] %s479_s28 }
  0x10   : > { %s481_s29 = scalar_lea.hbm %s480_s28, 8  ;;  %p483_p12 = pneg %p607_p8 }
  0x11   : > { %p482_p11 = scmp.ne.s32.totalorder %s480_s28, %s481_s29  ;;  %s486_s3 = scalar_lea.hbm %s765_s0, 16 }
  0x12   : > { %p487_p1 = scmp.lt.s32.totalorder %s480_s28, %s765_s0  ;;  %p488_p2 = scmp.lt.s32.totalorder %s486_s3, %s481_s29 }
  0x13   : > { %p484_p13 = pnand %p483_p12, %p482_p11 }
  0x14   : > { %p489_p3 = por %p488_p2, %p487_p1 }
  0x15   : > { %p485_p0 = pneg %p484_p13 }
  0x17   : > { %p490_p4 = pnand %p489_p3, %p485_p0 }
  0x19   : > { %493 = shalt.err (!%p490_p4)
}
  0x1a   : > { %442 = dma.hbm_to_vmem [thread:$0]  (!%p607_p8), %s95_s25, 128, %s97_s24, %s85_s27  }
  0x1b   : > { %p102_p5 = pnand %p368_p9, %p101_p10 }
  0x1c   : > { %s107_s6 = sand.u32 (!%p102_p5), 1, %s535_s7  }
  0x1d   : > { %105 = sbr.rel (%p102_p5) target bundleno = 219 (0xdb), region = 24  ;;  %s628_s12 = sshll.u32 (!%p102_p5), %s107_s6, 3 }
  0x1e   : > { %s108_s13 = scalar_lea.sflag (!%p102_p5), [#allocation3], %s107_s6  ;;  %s111_s15 = scalar_lea.vmem (!%p102_p5), [#allocation2], %s628_s12 }
  0x22   : > { %526 = dma.done.wait (%p596_p7), %s108_s13, 128  }
  0x23   : > { %528 = vsyncadd (%p596_p7), %s108_s13, 4294967168  ;;  %v134_v0 = vlaneseq  ;;  %v545_v12 = vmov 1.0|1.0   ;;  %v243_v14 = vld [vmem:[%s111_s15] sm:$0xff]  ;;  %p130_p6 = scmp.lt.s32.totalorder %s575_s10, 1 }
  0x24   : > { %v244_v17 = vadd.f32 1e-08, %v243_v14 }
  0x25   : > { %v635_v1 = vshrl.u32 %v134_v0, 7  ;;  %v152_v2 = vand.u32 127, %v134_v0  ;;  %s781_s10 = smov (!%p130_p6, %s575_s10), 1 }
  0x26   : > { %477 = vlog2.f32 %v244_v17  ;;  %s370_s9 = sshll.u32 %s781_s10, 3 }
  0x27   : > { %v149_v3 = vadd.s32 112, %v635_v1  ;;  %v150_v4 = vadd.s32 120, %v635_v1  ;;  %v639_v5 = vmul.u32 16, %v152_v2  ;;  %v147_v6 = vadd.s32 96, %v635_v1  ;;  %s133_s18 = scalar_lea.vmem %s766_s1, %s370_s9 }
  0x28   : > { %v148_v8 = vadd.s32 104, %v635_v1  ;;  %v145_v9 = vadd.s32 80, %v635_v1  ;;  %v146_v10 = vadd.s32 88, %v635_v1  ;;  %v143_v11 = vadd.s32 64, %v635_v1 }
  0x29   : > { %vm168_vm0 = vcmp.ge.s32.totalorder %v149_v3, %v639_v5  ;;  %v644_v7 = vadd.s32 16, %v639_v5  ;;  %vm169_vm1 = vcmp.ge.s32.totalorder %v150_v4, %v639_v5  ;;  %vm166_vm5 = vcmp.ge.s32.totalorder %v147_v6, %v639_v5 }
  0x2a   : > { %vm167_vm8 = vcmp.ge.s32.totalorder %v148_v8, %v639_v5  ;;  %vm164_vm12 = vcmp.ge.s32.totalorder %v145_v9, %v639_v5  ;;  %v144_v13 = vadd.s32 72, %v635_v1  ;;  %vm165_vm15 = vcmp.ge.s32.totalorder %v146_v10, %v639_v5 }
  0x2b   : > { %vm185_vm2 = vcmp.lt.s32.totalorder %v149_v3, %v644_v7  ;;  %vm186_vm3 = vcmp.lt.s32.totalorder %v150_v4, %v644_v7  ;;  %vm183_vm6 = vcmp.lt.s32.totalorder %v147_v6, %v644_v7  ;;  %vm184_vm9 = vcmp.lt.s32.totalorder %v148_v8, %v644_v7 }
  0x2c   : > { %vm201_vm4 = vmand %vm168_vm0, %vm185_vm2  ;;  %vm181_vm13 = vcmp.lt.s32.totalorder %v145_v9, %v644_v7  ;;  %vm182_vm0 = vcmp.lt.s32.totalorder %v146_v10, %v644_v7  ;;  %v141_v15 = vadd.s32 48, %v635_v1  ;;  %v142_v16 = vadd.s32 56, %v635_v1  ;;  %v478_v24 = vpop.eup %477 }
  0x2d   : > { %vm202_vm7 = vmand %vm169_vm1, %vm186_vm3  ;;  %vm162_vm3 = vcmp.ge.s32.totalorder %v143_v11, %v639_v5  ;;  %v139_v18 = vadd.s32 32, %v635_v1  ;;  %v140_v19 = vadd.s32 40, %v635_v1  ;;  %v137_v21 = vadd.s32 16, %v635_v1 }
  0x2e   : > { %vm387_vm10 = vmpackc.low %vm202_vm7, %vm201_vm4  ;;  %vm179_vm4 = vcmp.lt.s32.totalorder %v143_v11, %v644_v7  ;;  %vm180_vm7 = vcmp.lt.s32.totalorder %v144_v13, %v644_v7  ;;  %v138_v22 = vadd.s32 24, %v635_v1  ;;  %v246_v25 = vmul.f32 0.6931472, %v478_v24 }
  0x2f   : > { %388 = vmatpush.bf16.msk.msra.mxu0 %vm387_vm10, %v545_v12  ;;  %404 = vmatpush.bf16.msk.msra.mxu1 %vm387_vm10, %v545_v12  ;;  %vm199_vm11 = vmand %vm166_vm5, %vm183_vm6  ;;  %vm163_vm6 = vcmp.ge.s32.totalorder %v144_v13, %v639_v5  ;;  %v136_v27 = vadd.s32 8, %v635_v1 }
  0x30   : > { %420 = vmatpush.bf16.msk.msra.mxu2 %vm387_vm10, %v545_v12  ;;  %vm200_vm14 = vmand %vm167_vm8, %vm184_vm9  ;;  %vm160_vm10 = vcmp.ge.s32.totalorder %v141_v15, %v639_v5  ;;  %v247_v28 = vmul.f32 %v246_v25, %v243_v14 }
  0x31   : > { %vm389_vm1 = vmpackc.low %vm200_vm14, %vm199_vm11  ;;  %vm177_vm11 = vcmp.lt.s32.totalorder %v141_v15, %v644_v7  ;;  %vm178_vm14 = vcmp.lt.s32.totalorder %v142_v16, %v644_v7 }
  0x32   : > { %vm197_vm2 = vmand %vm164_vm12, %vm181_vm13  ;;  %vm161_vm13 = vcmp.ge.s32.totalorder %v142_v16, %v639_v5  ;;  %v248_v29 = vpack.c.bf16 %v247_v28, %v247_v28 }
  0x33   : > { %390 = vmatpush.bf16.msk.msra.mxu0 %vm389_vm1, %v545_v12  ;;  %406 = vmatpush.bf16.msk.msra.mxu1 %vm389_vm1, %v545_v12  ;;  %vm198_vm5 = vmand %vm165_vm15, %vm182_vm0 }
  0x34   : > { %422 = vmatpush.bf16.msk.msra.mxu2 %vm389_vm1, %v545_v12  ;;  %vm391_vm8 = vmpackc.low %vm198_vm5, %vm197_vm2  ;;  %vm158_vm1 = vcmp.ge.s32.totalorder %v139_v18, %v639_v5  ;;  %vm175_vm2 = vcmp.lt.s32.totalorder %v139_v18, %v644_v7  ;;  %vm176_vm5 = vcmp.lt.s32.totalorder %v140_v19, %v644_v7  ;;  %v249_v30 = vunpack.c.l.bf16 %v248_v29 }
  0x35   : > { %vm195_vm9 = vmand %vm162_vm3, %vm179_vm4  ;;  %vm159_vm4 = vcmp.ge.s32.totalorder %v140_v19, %v639_v5 }
  0x36   : > { %vm196_vm12 = vmand %vm163_vm6, %vm180_vm7  ;;  %v250_v31 = vsub.f32 %v247_v28, %v249_v30 }
  0x37   : > { %392 = vmatpush.bf16.msk.msra.mxu0 %vm391_vm8, %v545_v12  ;;  %408 = vmatpush.bf16.msk.msra.mxu1 %vm391_vm8, %v545_v12  ;;  %vm684_vm15 = vmpackc.low %vm196_vm12, %vm195_vm9  ;;  %vm156_vm9 = vcmp.ge.s32.totalorder %v137_v21, %v639_v5  ;;  %vm174_vm12 = vcmp.lt.s32.totalorder %v138_v22, %v644_v7 }
  0x38   : > { %424 = vmatpush.bf16.msk.msra.mxu2 %vm391_vm8, %v545_v12  ;;  %vm193_vm0 = vmand %vm160_vm10, %vm177_vm11  ;;  %vm173_vm10 = vcmp.lt.s32.totalorder %v137_v21, %v644_v7  ;;  %vm157_vm11 = vcmp.ge.s32.totalorder %v138_v22, %v639_v5  ;;  %v251_v32 = vpack.c.bf16 %v250_v31, %v250_v31 }
  0x39   : > { %vm194_vm3 = vmand %vm161_vm13, %vm178_vm14 }
  0x3a   : > { %vm695_vm6 = vmpackc.low %vm194_vm3, %vm193_vm0  ;;  %vm154_vm0 = vcmp.ge.s32.totalorder %v635_v1, %v639_v5  ;;  %vm172_vm3 = vcmp.lt.s32.totalorder %v136_v27, %v644_v7  ;;  %v252_v33 = vunpack.c.l.bf16 %v251_v32 }
  0x3b   : > { %394 = vmatpush.bf16.msk.msra.mxu0 %vm684_vm15, %v545_v12  ;;  %410 = vmatpush.bf16.msk.msra.mxu1 %vm684_vm15, %v545_v12  ;;  %vm191_vm7 = vmand %vm158_vm1, %vm175_vm2  ;;  %vm171_vm1 = vcmp.lt.s32.totalorder %v635_v1, %v644_v7  ;;  %vm155_vm2 = vcmp.ge.s32.totalorder %v136_v27, %v639_v5 }
  0x3c   : > { %426 = vmatpush.bf16.msk.msra.mxu2 %vm684_vm15, %v545_v12  ;;  %vm192_vm8 = vmand %vm159_vm4, %vm176_vm5  ;;  %v253_v34 = vsub.f32 %v250_v31, %v252_v33 }
  0x3d   : > { %vm712_vm13 = vmpackc.low %vm192_vm8, %vm191_vm7  ;;  %vm296_vm8 = vcmask 64512  }
  0x3e   : > { %vm189_vm14 = vmand %vm156_vm9, %vm173_vm10  ;;  %v254_v35 = vpack.c.bf16 %v253_v34, %v253_v34 }
  0x3f   : > { %396 = vmatpush.bf16.msk.msra.mxu0 %vm695_vm6, %v545_v12  ;;  %412 = vmatpush.bf16.msk.msra.mxu1 %vm695_vm6, %v545_v12  ;;  %vm190_vm15 = vmand %vm157_vm11, %vm174_vm12 }
  0x40   : > { %428 = vmatpush.bf16.msk.msra.mxu2 %vm695_vm6, %v545_v12  ;;  %vm399_vm4 = vmpackc.low %vm190_vm15, %vm189_vm14 }
  0x41   : > { %vm187_vm5 = vmand %vm154_vm0, %vm171_vm1 }
  0x42   : > { %vm188_vm6 = vmand %vm155_vm2, %vm172_vm3 }
  0x43   : > { %398 = vmatpush.bf16.msk.msra.mxu0 %vm712_vm13, %v545_v12  ;;  %414 = vmatpush.bf16.msk.msra.mxu1 %vm712_vm13, %v545_v12  ;;  %vm401_vm7 = vmpackc.low %vm188_vm6, %vm187_vm5 }
  0x44   : > { %430 = vmatpush.bf16.msk.msra.mxu2 %vm712_vm13, %v545_v12 }
  0x47   : > { %400 = vmatpush.bf16.msk.msra.mxu0 %vm399_vm4, %v545_v12  ;;  %416 = vmatpush.bf16.msk.msra.mxu1 %vm399_vm4, %v545_v12 }
  0x48   : > { %432 = vmatpush.bf16.msk.msra.mxu2 %vm399_vm4, %v545_v12 }
  0x4b   : > { %402 = vmatpush.bf16.msk.msra.mxu0 %vm401_vm7, %v545_v12  ;;  %418 = vmatpush.bf16.msk.msra.mxu1 %vm401_vm7, %v545_v12 }
  0x4c   : > { %434 = vmatpush.bf16.msk.msra.mxu2 %vm401_vm7, %v545_v12 }
  0x4e   : > { %263 = vmatmul.bf16.vlgmr.msra.gmra.mxu0 %v251_v32  ;;  %276 = vmatmul.bf16.vlgmr.msra.gmra.mxu1 %v248_v29 }
  0x4f   : > { %289 = vmatmul.bf16.vlgmr.msra.gmra.mxu2 %v254_v35 }
  0xcb   : > { %v264_v36 = vpop.f32.mrf.mxu0  ;;  %v277_v37 = vpop.f32.mrf.mxu1 }
  0xcc   : > { %v278_v38 = vadd.f32 %v277_v37, %v264_v36 }
  0xd2   : > { %v290_v39 = vpop.f32.mrf.mxu2 }
  0xd3   : > { %v294_v40 = vadd.f32 %v290_v39, %v278_v38  ;;  %v266_v41 = vpop.f32.mrf.mxu0  ;;  %v279_v42 = vpop.f32.mrf.mxu1 }
  0xd5   : > { %v295_v43 = vsub.f32 0.0, %v294_v40 }
  0xd7   : > { %297 = vst.msk [vmem:[%s133_s18] sm:$0xff] %vm296_vm8, %v295_v43 }
  0xda   : > { %v292_v44 = vpop.f32.mrf.mxu2 }
  0xdb PF: > { %p11_p7 = scmp.ge.s32.totalorder %s578_s11, 4   ;;  %s776_s6 = smov %s535_s7 }
  0xdc   : > { %s777_s7 = smov %s539_s8  ;;  %s778_s8 = smov %s588_s14 }
  0xdd   : > { %s779_s9 = smov %s578_s11  ;;  %13 = sbr.rel (!%p11_p7) target bundleno = 3 (0x3), region = 64 }
  0xe2   :  { %317 = vsyncpa [#allocation3], 1 }
  0xe3   :  { %319 = vsyncpa [#allocation3 + $0x1], 1 }

</bundles_post_ra>
